<compile_context>
chip_gen: v6e
topology: v6e:2x2x1
jax: 0.10.0
libtpu: 0.0.40
codegen_flags: <defaults>
</compile_context>

<pallas_src>
import functools

import jax
import jax.numpy as jnp
import numpy as np
from jax.experimental import pallas as pl
from jax.experimental.pallas import tpu as pltpu

LANE = 128           # TPU vreg lane width; channel dims are padded to this.
F32 = jnp.float32


def _round_up(n, m):
    return ((n + m - 1) // m) * m


# ----------------------------------------------------------------------------
# One-time probe of pltpu.roll direction (defensive: makes the causal shift
# robust to either rotate convention; expected np.roll-like).
# ----------------------------------------------------------------------------
@functools.lru_cache(maxsize=1)
def _roll_is_np_like():
    """True iff pltpu.roll(x, s, axis)[i] == x[i - s]  (np.roll convention)."""
    def kern(x_ref, o_ref):
        o_ref[...] = pltpu.roll(x_ref[...], shift=1, axis=0)

    x = jnp.arange(8 * 128, dtype=F32).reshape(8, 128)
    y = pl.pallas_call(kern, out_shape=jax.ShapeDtypeStruct((8, 128), F32))(x)
    return bool(np.asarray(y)[1, 0] == np.asarray(x)[0, 0])


# ----------------------------------------------------------------------------
# Fused TCN kernel (all TemporalBlocks + decoder Linear in one pallas_call)
# ----------------------------------------------------------------------------
def _make_tcn_kernel(layer_meta, T, rows, compute_dtype, roll_np_like):
    """layer_meta: tuple of (dilation, has_downsample) per TemporalBlock."""

    def kernel(x_ref, *refs):
        o_ref = refs[-1]
        wrefs = refs[:-1]

        def causal_shift(v, d):
            # v[i] -> v[i - d] with zero fill for (t mod T) < d.  The roll acts
            # on the flattened (batch_block*T, C) rows; any row that would pull
            # data across a batch boundary has (t mod T) < d and is zeroed by
            # the mask, so batches never mix.
            amt = (d if roll_np_like else (rows - d)) % rows
            shifted = pltpu.roll(v, shift=amt, axis=0)
            t = jax.lax.broadcasted_iota(jnp.int32, v.shape, 0) % T
            return jnp.where(t >= d, shifted, 0.0)

        h = x_ref[...].astype(F32)                       # (rows, Cin_pad)
        i = 0
        for dilation, has_ds in layer_meta:
            w1 = wrefs[i][...]; b1 = wrefs[i + 1][...]
            w2 = wrefs[i + 2][...]; b2 = wrefs[i + 3][...]
            i += 4
            if has_ds:
                wd = wrefs[i][...]; bd = wrefs[i + 1][...]
                i += 2

            # conv1 (kernel_size=2, causal dilated) + chomp + ReLU, both taps
            # fused into one MXU dot with K = 2*Cin_pad.  (dropout = identity)
            z1 = jnp.concatenate([causal_shift(h, dilation), h], axis=-1)
            h1 = jnp.dot(z1.astype(compute_dtype), w1,
                         preferred_element_type=F32) + b1
            h1 = jnp.maximum(h1, 0.0)

            # conv2 + chomp + ReLU.
            z2 = jnp.concatenate([causal_shift(h1, dilation), h1], axis=-1)
            h2 = jnp.dot(z2.astype(compute_dtype), w2,
                         preferred_element_type=F32) + b2
            h2 = jnp.maximum(h2, 0.0)

            # residual branch (1x1 downsample conv when Cin != Cout) + ReLU.
            if has_ds:
                res = jnp.dot(h.astype(compute_dtype), wd,
                              preferred_element_type=F32) + bd
            else:
                res = h
            h = jnp.maximum(h2 + res, 0.0)

        # decoder: nn.Linear(hidden, word_f), lane-dense (128-padded) store.
        wdec = wrefs[i][...]; bdec = wrefs[i + 1][...]
        o_ref[...] = jnp.dot(h.astype(compute_dtype), wdec,
                             preferred_element_type=F32) + bdec

    return kernel


# ----------------------------------------------------------------------------
# Model wrapper: embedding gather, weight packing/padding, pallas_call.
# ----------------------------------------------------------------------------
def text_encoder_tcn_forward(tokens, params, kernel_size=2, *,
                             compute_dtype=jnp.float32, batch_block=None):
    assert kernel_size == 2, "Pallas path implemented for kernel_size=2 (module default)"
    B, T = tokens.shape
    word_f = params["dec_w"].shape[0]

    if batch_block is None:
        # >=2 parallel grid steps when possible (v7x megacore), while keeping
        # batch_block*T rows per step as the matmul M dimension.
        batch_block = B // 2 if (B % 2 == 0 and B >= 4) else B
    assert B % batch_block == 0
    rows = batch_block * T
    assert rows % 8 == 0 or batch_block == B

    # TODO(synk): the nn.Embedding row-gather stays as jnp.take in the JAX
    # wrapper (data-dependent gather has no clean BlockSpec form).
    emb = jnp.take(params["embedding"], tokens, axis=0).astype(F32)   # (B,T,E)
    E = emb.shape[-1]
    e_pad = _round_up(E, LANE)
    x2 = jnp.zeros((B * T, e_pad), F32).at[:, :E].set(emb.reshape(B * T, E))

    inputs = [x2]
    in_specs = [pl.BlockSpec((rows, e_pad), lambda i: (i, 0))]
    layer_meta = []

    def add_full(arr):
        inputs.append(arr)
        nd = arr.ndim
        in_specs.append(pl.BlockSpec(arr.shape, lambda i, _nd=nd: (0,) * _nd))

    # Pack conv weights: PyTorch (Cout, Cin, 2) -> (2*Cin_pad, Cout_pad) with
    # tap 0 (applied to x[t-d]) in rows [0:Cin] and tap 1 (x[t]) in rows
    # [Cin_pad : Cin_pad+Cin]; zero padding keeps results exact.
    cin_pad = e_pad
    for blk in params["blocks"]:
        cout, cin, _ = blk["w1"].shape
        cout_pad = _round_up(cout, LANE)

        w1 = jnp.zeros((2 * cin_pad, cout_pad), F32)
        w1 = w1.at[:cin, :cout].set(blk["w1"][:, :, 0].T)
        w1 = w1.at[cin_pad:cin_pad + cin, :cout].set(blk["w1"][:, :, 1].T)
        b1 = jnp.zeros((1, cout_pad), F32).at[0, :cout].set(blk["b1"])

        w2 = jnp.zeros((2 * cout_pad, cout_pad), F32)
        w2 = w2.at[:cout, :cout].set(blk["w2"][:, :, 0].T)
        w2 = w2.at[cout_pad:cout_pad + cout, :cout].set(blk["w2"][:, :, 1].T)
        b2 = jnp.zeros((1, cout_pad), F32).at[0, :cout].set(blk["b2"])

        add_full(w1.astype(compute_dtype)); add_full(b1)
        add_full(w2.astype(compute_dtype)); add_full(b2)

        has_ds = "wd" in blk
        if has_ds:
            wd = jnp.zeros((cin_pad, cout_pad), F32)
            wd = wd.at[:cin, :cout].set(blk["wd"][:, :, 0].T)
            bd = jnp.zeros((1, cout_pad), F32).at[0, :cout].set(blk["bd"])
            add_full(wd.astype(compute_dtype)); add_full(bd)

        layer_meta.append((int(blk["dilation"]), has_ds))
        cin_pad = cout_pad

    # decoder weights, padded to a lane-dense 128-multiple output width.
    H = params["dec_w"].shape[1]
    f_pad = _round_up(word_f, LANE)
    wdec = jnp.zeros((cin_pad, f_pad), F32).at[:H, :word_f].set(params["dec_w"].T)
    bdec = jnp.zeros((1, f_pad), F32).at[0, :word_f].set(params["dec_b"])
    add_full(wdec.astype(compute_dtype)); add_full(bdec)

    kernel = _make_tcn_kernel(tuple(layer_meta), T, rows, compute_dtype,
                              _roll_is_np_like())

    out = pl.pallas_call(
        kernel,
        out_shape=jax.ShapeDtypeStruct((B * T, f_pad), F32),
        grid=(B // batch_block,),
        in_specs=in_specs,
        out_specs=pl.BlockSpec((rows, f_pad), lambda i: (i, 0)),
        compiler_params=pltpu.CompilerParams(
            dimension_semantics=("parallel",),
            vmem_limit_bytes=64 * 1024 * 1024),
    )(*inputs)

    y = out.reshape(B, T, f_pad)[:, :, :word_f]
    return y, 0


# ----------------------------------------------------------------------------
# Deterministic parameter init (shapes match TextEncoderTCN.__init__)
# ----------------------------------------------------------------------------
def init_params(key, n_words, embed_size, hidden_size, n_layer, word_f,
                kernel_size=2):
    keys = iter(jax.random.split(key, 64))
    params = {
        "embedding": jax.random.normal(next(keys), (n_words, embed_size), F32),
    }
    blocks = []
    in_c = embed_size
    for i in range(n_layer):
        out_c = hidden_size
        blk = {
            "dilation": 2 ** i,
            "w1": 0.01 * jax.random.normal(next(keys),
                                           (out_c, in_c, kernel_size), F32),
            "b1": 0.01 * jax.random.normal(next(keys), (out_c,), F32),
            "w2": 0.01 * jax.random.normal(next(keys),
                                           (out_c, out_c, kernel_size), F32),
            "b2": 0.01 * jax.random.normal(next(keys), (out_c,), F32),
        }
        if in_c != out_c:   # downsample 1x1 conv
            blk["wd"] = 0.01 * jax.random.normal(next(keys), (out_c, in_c, 1), F32)
            blk["bd"] = 0.01 * jax.random.normal(next(keys), (out_c,), F32)
        blocks.append(blk)
        in_c = out_c
    params["blocks"] = blocks
    params["dec_w"] = 0.01 * jax.random.normal(next(keys), (word_f, hidden_size), F32)
    params["dec_b"] = jnp.zeros((word_f,), F32)
    return params


# ----------------------------------------------------------------------------
# Pure-JAX reference (lax.conv_general_dilated) for correctness check
# ----------------------------------------------------------------------------
def _causal_conv_ref(x_nct, w, b, dilation):
    pad = (w.shape[-1] - 1) * dilation
    out = jax.lax.conv_general_dilated(
        x_nct, w, window_strides=(1,), padding=[(pad, 0)],
        rhs_dilation=(dilation,), dimension_numbers=("NCH", "OIH", "NCH"))
    return out + b[None, :, None]


def ref_forward(tokens, params):
    x = jnp.take(params["embedding"], tokens, axis=0)       # (B, T, E)
    h = jnp.transpose(x, (0, 2, 1))                          # (B, C, T)
    for blk in params["blocks"]:
        d = blk["dilation"]
        o = jax.nn.relu(_causal_conv_ref(h, blk["w1"], blk["b1"], d))
        o = jax.nn.relu(_causal_conv_ref(o, blk["w2"], blk["b2"], d))
        if "wd" in blk:
            res = jax.lax.conv_general_dilated(
                h, blk["wd"], window_strides=(1,), padding=[(0, 0)],
                dimension_numbers=("NCH", "OIH", "NCH")) + blk["bd"][None, :, None]
        else:
            res = h
        h = jax.nn.relu(o + res)
    y = jnp.transpose(h, (0, 2, 1))
    return y @ params["dec_w"].T + params["dec_b"][None, None, :]


# ----------------------------------------------------------------------------
if __name__ == "__main__":
    # small, module-consistent shapes
    B, T = 4, 16
    n_words, embed_size = 50, 64        # embed_size != hidden -> downsample path
    hidden_size, n_layer = 32, 2        # dilations 1, 2
    word_f, kernel_size = 16, 2

    key = jax.random.PRNGKey(0)
    k_params, k_tokens = jax.random.split(key)
    params = init_params(k_params, n_words, embed_size, hidden_size, n_layer,
                         word_f, kernel_size)
    tokens = jax.random.randint(k_tokens, (B, T), 0, n_words)

    y_ref = ref_forward(tokens, params)

    # f32 MXU path: matches the lax.conv reference tightly.
    y32, aux = text_encoder_tcn_forward(tokens, params, kernel_size,
                                        compute_dtype=jnp.float32)
    y32 = jax.block_until_ready(y32)
    assert y32.shape == (B, T, word_f) and aux == 0
    np.testing.assert_allclose(np.asarray(y32), np.asarray(y_ref),
                               rtol=1e-4, atol=1e-5)

    # bf16 MXU path (v6e/v7x throughput): f32 accumulation, looser tolerance.
    ybf, _ = text_encoder_tcn_forward(tokens, params, kernel_size,
                                      compute_dtype=jnp.bfloat16)
    ybf = jax.block_until_ready(ybf)
    np.testing.assert_allclose(np.asarray(ybf), np.asarray(y_ref),
                               rtol=5e-2, atol=3e-3)

    print("KERNEL_OK")
</pallas_src>

<mosaic_0001>
module attributes {stable_mosaic.version = 11 : i64} {
  func.func @kern(%arg0: memref<8x128xf32, #tpu.memory_space<vmem>>, %arg1: memref<8x128xf32, #tpu.memory_space<vmem>>) attributes {dimension_semantics = [], scalar_prefetch = 0 : i64, scratch_operands = 0 : i64, tpu.core_type = #tpu.core_type<tc>} {
    %c0 = arith.constant 0 : index
    %c0_0 = arith.constant 0 : index
    %0 = vector.load %arg0[%c0, %c0_0] : memref<8x128xf32, #tpu.memory_space<vmem>>, vector<8x128xf32>
    %c1_i32 = arith.constant 1 : i32
    %1 = tpu.dynamic_rotate %0 by %c1_i32 dim 0 : vector<8x128xf32>, i32 -> vector<8x128xf32>
    %c0_1 = arith.constant 0 : index
    %c0_2 = arith.constant 0 : index
    %2 = vector.load %arg1[%c0_1, %c0_2] : memref<8x128xf32, #tpu.memory_space<vmem>>, vector<8x128xf32>
    tpu.vector_store %arg1[%c0_1, %c0_2], %1 {strides = array<i32>} : memref<8x128xf32, #tpu.memory_space<vmem>>, vector<8x128xf32>,
    return
  }
}

</mosaic_0001>

<bundles_post_ra>
// kernel: tpu_custom_call.1
= control target key start
LH: loop header
LB: loop body
LE: loop exit
PB: predicated region body
PF: predicated region fallthrough
CT: control target
= control target key end

     0   :  { %6 = vsyncpa [#allocation3], 0  ;;  %s103_s0 = inlined_call_operand.hbm [shape: f32[8,128], index: 0, kind: input, shape index: {}]   ;;  %s104_s1 = inlined_call_operand.hbm [shape: f32[8,128], index: 1, kind: output, shape index: {}]  }
   0x1   :  { %7 = vsyncpa [#allocation4], 0  ;;  %s85_s6 = smov [#allocation2]  }
   0x2   :  { %s14_s7 = sshll.u32 %s85_s6, 4  ;;  %s15_s7 = int_to_ptr.vmem [resolvable:$true] %s14_s7 }
   0x3   :  { %s49_s8 = scalar_lea.vmem %s15_s7, 128  ;;  %p54_p1 = scmp.lt.s32.totalorder %s15_s7, %s15_s7 }
   0x4   :  { %p50_p0 = scmp.ne.s32.totalorder %s15_s7, %s49_s8  ;;  %p55_p2 = scmp.lt.s32.totalorder %s49_s8, %s49_s8 }
   0x6   :  { %p56_p3 = por %p55_p2, %p54_p1 }
   0x8   :  { %p57_p4 = pnand %p56_p3, %p50_p0 }
   0xa   :  { %60 = shalt.err (!%p57_p4)
}
   0xb   :  { %17 = dma.hbm_to_vmem [thread:$0]  %s103_s0, 128, %s15_s7, [#allocation3]  }
   0xc   :  { %81 = dma.done.wait [#allocation3], 128  }
   0xd   :  { %82 = vsyncadd [#allocation3], 4294967168  ;;  %s86_s11 = smov [#allocation5]   ;;  %v21_v0 = vld [vmem:[#allocation2] sm:$0xff] }
   0xe   :  { %s30_s12 = sshll.u32 %s86_s11, 4  ;;  %v22_v1 = vrot.slane %v21_v0, 7  ;;  %s31_s12 = int_to_ptr.vmem [resolvable:$true] %s30_s12 }
   0xf   :  { %s61_s13 = scalar_lea.vmem %s31_s12, 128  ;;  %p66_p6 = scmp.lt.s32.totalorder %s31_s12, %s31_s12 }
  0x10   :  { %23 = vst [vmem:[#allocation5] sm:$0xff] %v22_v1  ;;  %p62_p5 = scmp.ne.s32.totalorder %s31_s12, %s61_s13  ;;  %p67_p7 = scmp.lt.s32.totalorder %s61_s13, %s61_s13 }
  0x12   :  { %p68_p8 = por %p67_p7, %p66_p6 }
  0x14   :  { %p69_p9 = pnand %p68_p8, %p62_p5 }
  0x16   :  { %72 = shalt.err (!%p69_p9)
}
  0x17   :  { %33 = dma.vmem_to_hbm [thread:$0]  %s31_s12, 128, %s104_s1, [#allocation4]  }
  0x18   :  { %83 = dma.done.wait [#allocation4], 128  }
  0x19   :  { %84 = vsyncadd [#allocation4], 4294967168 }
  0x1a   :  { %37 = vsyncpa [#allocation3], 1 }
  0x1b   :  { %38 = vsyncpa [#allocation4], 1 }

</bundles_post_ra>
